<compile_context>
chip_gen: v7x
topology: tpu7x:2x2x1
jax: 0.10.0
libtpu: 0.0.40
codegen_flags: <defaults>
</compile_context>

<pallas_src>
import jax
import jax.numpy as jnp
from jax import lax
from jax.experimental import pallas as pl
from jax.experimental.pallas import tpu as pltpu


def _round_up(n, m):
    return (n + m - 1) // m * m


# -----------------------------------------------------------------------------
# Kernel: one (batch-tile, class-tile) output block, reduced over D-tiles.
# P3 accumulator pattern: K axis is last / "arbitrary"; bias added on finalize.
# -----------------------------------------------------------------------------
def _linear_kernel(x_ref, w_ref, b_ref, o_ref, acc_ref):
    k = pl.program_id(2)

    @pl.when(k == 0)
    def _():
        acc_ref[...] = jnp.zeros_like(acc_ref)

    # x: (TB, TK) contracted with w: (TC, TK) on the last axis == x @ W.T tile.
    acc_ref[...] += lax.dot_general(
        x_ref[...],
        w_ref[...],
        dimension_numbers=(((1,), (1,)), ((), ())),
        preferred_element_type=jnp.float32,
    )

    @pl.when(k == pl.num_programs(2) - 1)
    def _():
        o_ref[...] = (acc_ref[...] + b_ref[...]).astype(o_ref.dtype)


# -----------------------------------------------------------------------------
# Tiling heuristics (generation-aware via VMEM capacity).
# -----------------------------------------------------------------------------
def _vmem_capacity_bytes():
    try:
        return int(pltpu.get_tpu_info().vmem_capacity_bytes)
    except Exception:
        return 64 * 1024 * 1024  # conservative fallback (v7x per-TC VMEM)


def _choose_tiles(B, D, Cp, in_itemsize, out_itemsize):
    cap = _vmem_capacity_bytes()
    budget = (cap * 3) // 4  # leave headroom for Mosaic internals

    # Class tile: multiple of 128 that divides Cp (lane-dense stores, bounded W tile).
    tc = min(Cp, 512)
    while Cp % tc:
        tc -= 128

    # Reduction tile: keep TK == D unless D is a large multiple of 128, in which
    # case pick a multiple-of-128 divisor so no partial K blocks pollute the acc.
    tk = D
    if D % 128 == 0 and D > 2048:
        for cand in range(2048, 0, -128):
            if D % cand == 0:
                tk = cand
                break

    # Batch tile: biggest multiple of 8 whose double-buffered footprint fits.
    tb_cap = 1024 if cap >= 96 * 1024 * 1024 else 512
    tb = min(tb_cap, _round_up(B, 8))

    def footprint(tb_):
        return (2 * tb_ * tk * in_itemsize       # x (double-buffered)
                + 2 * tc * tk * in_itemsize      # W tile (double-buffered)
                + 2 * tc * 4                     # bias tile
                + 2 * tb_ * tc * out_itemsize    # out tile (double-buffered)
                + tb_ * tc * 4)                  # f32 accumulator scratch

    while tb > 8 and footprint(tb) > budget:
        tb = max(8, _round_up(tb // 2, 8))

    vmem_limit = max(budget, 32 * 1024 * 1024)
    return tb, tc, tk, vmem_limit


# -----------------------------------------------------------------------------
# Param prep (done ONCE at model init, hoisted off the per-call path).
# -----------------------------------------------------------------------------
def prepare_head_params(weight, bias, compute_dtype=jnp.bfloat16):
    """weight: [C, D] (PyTorch nn.Linear layout), bias: [C].

    Returns (w_p [Cp, D] in compute_dtype, b_p [1, Cp] f32, C) with Cp a
    multiple of 128 (zero padding) so kernel stores are lane-dense.
    """
    C, D = weight.shape
    Cp = _round_up(C, 128)
    if Cp != C:
        weight = jnp.pad(weight, ((0, Cp - C), (0, 0)))
        bias = jnp.pad(bias, (0, Cp - C))
    w_p = weight.astype(compute_dtype)
    b_p = bias.astype(jnp.float32).reshape(1, Cp)
    return w_p, b_p, C


# -----------------------------------------------------------------------------
# Forward pass.
# -----------------------------------------------------------------------------
def classification_head_pallas(x, w_p, b_p, num_classes,
                               *, compute_dtype=jnp.bfloat16):
    """x: [B, D]; w_p: [Cp, D] (padded, compute_dtype); b_p: [1, Cp] f32."""
    B, D = x.shape
    Cp = w_p.shape[0]
    out_dtype = x.dtype

    x_c = x.astype(compute_dtype)

    tb, tc, tk, vmem_limit = _choose_tiles(
        B, D, Cp,
        in_itemsize=jnp.dtype(compute_dtype).itemsize,
        out_itemsize=jnp.dtype(out_dtype).itemsize,
    )
    grid = (pl.cdiv(B, tb), Cp // tc, D // tk)

    out = pl.pallas_call(
        _linear_kernel,
        out_shape=jax.ShapeDtypeStruct((B, Cp), out_dtype),
        grid=grid,
        in_specs=[
            pl.BlockSpec((tb, tk), lambda i, j, k: (i, k)),   # x: streamed over batch/K
            pl.BlockSpec((tc, tk), lambda i, j, k: (j, k)),   # W tile
            pl.BlockSpec((1, tc), lambda i, j, k: (0, j)),    # bias tile (f32)
        ],
        out_specs=pl.BlockSpec((tb, tc), lambda i, j, k: (i, j)),
        scratch_shapes=[pltpu.VMEM((tb, tc), jnp.float32)],
        compiler_params=pltpu.CompilerParams(
            dimension_semantics=("parallel", "parallel", "arbitrary"),
            vmem_limit_bytes=vmem_limit,
        ),
    )(x_c, w_p, b_p)

    if Cp != num_classes:
        # TODO(synk): downstream consumers that can mask padded columns may
        # skip this slice to avoid the extra HBM pass.
        out = out[:, :num_classes]
    return out


def classification_head_forward(features, w_p, b_p, num_classes):
    """Mirrors ClassificationHead.forward(features)."""
    return classification_head_pallas(
        features["sentence_embedding"], w_p, b_p, num_classes)


if __name__ == "__main__":
    batch = 2
    embedding_dim = 32
    num_classes = 2

    key = jax.random.PRNGKey(0)
    k_x, k_w, k_b = jax.random.split(key, 3)

    # Synthetic nn.Linear-shaped parameters.
    bound = 1.0 / (embedding_dim ** 0.5)
    weight = jax.random.uniform(
        k_w, (num_classes, embedding_dim), jnp.float32, -bound, bound)
    bias = jax.random.uniform(k_b, (num_classes,), jnp.float32, -bound, bound)

    sentence_embedding = jax.random.normal(
        k_x, (batch, embedding_dim), jnp.float32)
    features = {"sentence_embedding": sentence_embedding}

    # Pad / cast params once at "init" (hoisted off the per-call path).
    w_p, b_p, C = prepare_head_params(weight, bias, compute_dtype=jnp.bfloat16)

    out = classification_head_forward(features, w_p, b_p, C)
    out = jax.block_until_ready(out)

    # Reference with matching precision (bf16-rounded inputs, f32 accumulation)
    # and a looser check against the pure-f32 reference.
    x_r = sentence_embedding.astype(jnp.bfloat16).astype(jnp.float32)
    w_r = weight.astype(jnp.bfloat16).astype(jnp.float32)
    ref_bf16 = x_r @ w_r.T + bias
    ref_f32 = sentence_embedding @ weight.T + bias

    assert out.shape == (batch, num_classes)
    assert out.dtype == sentence_embedding.dtype
    assert jnp.allclose(out, ref_bf16, atol=1e-3, rtol=1e-3)
    assert jnp.allclose(out, ref_f32, atol=5e-2, rtol=5e-2)

    print("KERNEL_OK")
</pallas_src>

<mosaic_0001>
module attributes {stable_mosaic.version = 11 : i64} {
  func.func @_linear_kernel(%arg0: i32, %arg1: i32, %arg2: i32, %arg3: memref<8x32xbf16, #tpu.memory_space<vmem>>, %arg4: memref<128x32xbf16, #tpu.memory_space<vmem>>, %arg5: memref<1x128xf32, #tpu.memory_space<vmem>>, %arg6: memref<8x128xf32, #tpu.memory_space<vmem>>, %arg7: memref<8x128xf32, #tpu.memory_space<vmem>>) attributes {dimension_semantics = [#tpu.dimension_semantics<parallel>, #tpu.dimension_semantics<parallel>, #tpu.dimension_semantics<arbitrary>], iteration_bounds = array<i64: 1, 1, 1>, scalar_prefetch = 0 : i64, scratch_operands = 1 : i64, tpu.core_type = #tpu.core_type<tc>, window_params = [{transform_indices = @transform_0, window_bounds = array<i64: 8, 32>}, {transform_indices = @transform_1, window_bounds = array<i64: 128, 32>}, {transform_indices = @transform_2, window_bounds = array<i64: 1, 128>}, {transform_indices = @transform_3, window_bounds = array<i64: 8, 128>}]} {
    %c0_i32 = arith.constant 0 : i32
    %0 = arith.cmpi eq, %arg2, %c0_i32 : i32
    %1 = arith.extui %0 : i1 to i32
    %c0_i32_0 = arith.constant 0 : i32
    %2 = arith.cmpi ne, %1, %c0_i32_0 : i32
    scf.if %2 {
      %cst_10 = arith.constant 0.000000e+00 : f32
      %12 = vector.broadcast %cst_10 : f32 to vector<8x128xf32>
      %c0_11 = arith.constant 0 : index
      %c0_12 = arith.constant 0 : index
      %13 = vector.load %arg7[%c0_11, %c0_12] : memref<8x128xf32, #tpu.memory_space<vmem>>, vector<8x128xf32>
      tpu.vector_store %arg7[%c0_11, %c0_12], %12 {strides = array<i32>} : memref<8x128xf32, #tpu.memory_space<vmem>>, vector<8x128xf32>,
    } else {
    }
    %c0 = arith.constant 0 : index
    %c0_1 = arith.constant 0 : index
    %3 = vector.load %arg7[%c0, %c0_1] : memref<8x128xf32, #tpu.memory_space<vmem>>, vector<8x128xf32>
    %c0_2 = arith.constant 0 : index
    %c0_3 = arith.constant 0 : index
    %4 = vector.load %arg3[%c0_2, %c0_3] : memref<8x32xbf16, #tpu.memory_space<vmem>>, vector<8x32xbf16>
    %c0_4 = arith.constant 0 : index
    %c0_5 = arith.constant 0 : index
    %5 = vector.load %arg4[%c0_4, %c0_5] : memref<128x32xbf16, #tpu.memory_space<vmem>>, vector<128x32xbf16>
    %cst = arith.constant dense<0.000000e+00> : vector<8x128xf32>
    %6 = tpu.matmul %4, %5, %cst {dimension_numbers = #tpu.dot_dimension_numbers<[1], [1], [0], [0], [0, 0, 1, 0], [], []>} : vector<8x32xbf16>, vector<128x32xbf16>, vector<8x128xf32> -> vector<8x128xf32>
    %7 = arith.addf %3, %6 : vector<8x128xf32>
    %c0_6 = arith.constant 0 : index
    %c0_7 = arith.constant 0 : index
    %8 = vector.load %arg7[%c0_6, %c0_7] : memref<8x128xf32, #tpu.memory_space<vmem>>, vector<8x128xf32>
    tpu.vector_store %arg7[%c0_6, %c0_7], %7 {strides = array<i32>} : memref<8x128xf32, #tpu.memory_space<vmem>>, vector<8x128xf32>,
    %c0_i32_8 = arith.constant 0 : i32
    %9 = arith.cmpi eq, %arg2, %c0_i32_8 : i32
    %10 = arith.extui %9 : i1 to i32
    %c0_i32_9 = arith.constant 0 : i32
    %11 = arith.cmpi ne, %10, %c0_i32_9 : i32
    scf.if %11 {
      %c0_10 = arith.constant 0 : index
      %c0_11 = arith.constant 0 : index
      %12 = vector.load %arg7[%c0_10, %c0_11] : memref<8x128xf32, #tpu.memory_space<vmem>>, vector<8x128xf32>
      %c0_12 = arith.constant 0 : index
      %c0_13 = arith.constant 0 : index
      %13 = vector.load %arg5[%c0_12, %c0_13] : memref<1x128xf32, #tpu.memory_space<vmem>>, vector<1x128xf32>
      %14 = vector.broadcast %13 : vector<1x128xf32> to vector<8x128xf32>
      %15 = arith.addf %12, %14 : vector<8x128xf32>
      %c0_14 = arith.constant 0 : index
      %c0_15 = arith.constant 0 : index
      %16 = vector.load %arg6[%c0_14, %c0_15] : memref<8x128xf32, #tpu.memory_space<vmem>>, vector<8x128xf32>
      tpu.vector_store %arg6[%c0_14, %c0_15], %15 {strides = array<i32>} : memref<8x128xf32, #tpu.memory_space<vmem>>, vector<8x128xf32>,
    } else {
    }
    return
  }
  func.func @transform_0(%arg0: i32, %arg1: i32, %arg2: i32) -> (i32, i32) {
    %c0_i32 = arith.constant 0 : i32
    return %arg0, %arg2 : i32, i32
  }
  func.func @transform_1(%arg0: i32, %arg1: i32, %arg2: i32) -> (i32, i32) {
    %c0_i32 = arith.constant 0 : i32
    return %arg1, %arg2 : i32, i32
  }
  func.func @transform_2(%arg0: i32, %arg1: i32, %arg2: i32) -> (i32, i32) {
    %c0_i32 = arith.constant 0 : i32
    %c0_i32_0 = arith.constant 0 : i32
    return %c0_i32, %arg1 : i32, i32
  }
  func.func @transform_3(%arg0: i32, %arg1: i32, %arg2: i32) -> (i32, i32) {
    %c0_i32 = arith.constant 0 : i32
    return %arg0, %arg1 : i32, i32
  }
}

</mosaic_0001>

<bundles_post_ra>
// kernel: tpu_custom_call.1
= control target key start
LH: loop header
LB: loop body
LE: loop exit
PB: predicated region body
PF: predicated region fallthrough
CT: control target
= control target key end

     0   :  { %8 = vsyncpa [#allocation4], 0  ;;  %v286_v1 = vmov 0.0   ;;  %vm110_vm0 = vcmask 261120   ;;  %vm287_vm1 = vmmov 0   ;;  %v51_v15 = vlaneseq  ;;  %s372_s0 = inlined_call_operand.vmem [shape: bf16[2,32], index: 0, kind: input, shape index: {}]   ;;  %s373_s1 = inlined_call_operand.vmem [shape: bf16[128,32], index: 1, kind: input, shape index: {}]   ;;  %s374_s2 = inlined_call_operand.vmem [shape: f32[1,128], index: 2, kind: input, shape index: {}]   ;;  %s375_s3 = inlined_call_operand.hbm [shape: f32[2,128], index: 3, kind: output, shape index: {}]  }
   0x1   :  { %v254_v0 = vld [vmem:[%s373_s1] sm:$0xff]   ;;  %228 = vmatprep.subr.bf16.mxu0 %v286_v1  ;;  %v255_v3 = vld [vmem:[%s373_s1 + $0x8] sm:$0xff]   ;;  %244 = vmatprep.mubr.msk.bf16.mxu0 %vm287_vm1, %v286_v1  ;;  %v256_v5 = vld [vmem:[%s373_s1 + $0x10] sm:$0xff]   ;;  %v288_v13 = vmov 1966171168  }
   0x2   :  { %v115_v2 = vsel %vm110_vm0, %v254_v0, 0  ;;  %v118_v4 = vsel %vm110_vm0, %v255_v3, 0  ;;  %v121_v6 = vsel %vm110_vm0, %v256_v5, 0  ;;  %v257_v7 = vld [vmem:[%s373_s1 + $0x18] sm:$0xff]   ;;  %v258_v9 = vld [vmem:[%s373_s1 + $0x20] sm:$0xff]   ;;  %v259_v11 = vld [vmem:[%s373_s1 + $0x28] sm:$0xff]   ;;  %v49_v14 = vunpack.c.l.s4 %v288_v13 }
   0x3   :  { %229 = vmatpush3.bf16.xpose.msra.mxu0 %v115_v2  ;;  %v124_v8 = vsel %vm110_vm0, %v257_v7, 0  ;;  %v127_v10 = vsel %vm110_vm0, %v258_v9, 0  ;;  %v130_v12 = vsel %vm110_vm0, %v259_v11, 0  ;;  %v260_v16 = vld [vmem:[%s373_s1 + $0x30] sm:$0xff]   ;;  %v22_v17 = vld [vmem:[%s372_s0] sm:$0x1] }
   0x4   :  { %230 = vmatprep.subr.bf16.mxu0 %v286_v1  ;;  %v50_v18 = vunpack.c.0.s8 %v49_v14  ;;  %v52_v19 = vshrl.u32 %v51_v15, 7  ;;  %v23_v20 = vld [vmem:[%s372_s0 + $0x1] sm:$0x1]  ;;  %v24_v21 = vld [vmem:[%s372_s0 + $0x2] sm:$0x1]  ;;  %v133_v23 = vsel %vm110_vm0, %v260_v16, 0 }
   0x5   :  { %v25_v22 = vld [vmem:[%s372_s0 + $0x3] sm:$0x1]  ;;  %v46_v24 = vcombine.low %v22_v17, %v23_v20  ;;  %v261_v27 = vld [vmem:[%s373_s1 + $0x38] sm:$0xff]   ;;  %v218_v33 = vld [vmem:[%s374_s2] ss:$0 sm:$0xff] }
   0x6   :  { %v47_v25 = vcombine.low %v24_v21, %v25_v22  ;;  %v53_v26 = vsub.s32 %v50_v18, %v52_v19  ;;  %v136_v30 = vsel %vm110_vm0, %v261_v27, 0 }
   0x8   :  { %v54_v28 = vrot.slane %v46_v24, %v53_v26  ;;  %v61_v29 = vrot.slane %v47_v25, %v53_v26 }
   0xa   :  { %v62_v31 = vcombine.low %v54_v28, %v61_v29 }
   0xb   :  { %231 = vmatpush3.bf16.xpose.msra.mxu0 %v118_v4 }
   0xc   :  { %232 = vmatprep.subr.bf16.mxu0 %v286_v1  ;;  %v69_v32 = vrot.slane %v62_v31, %v53_v26 }
  0x13   :  { %233 = vmatpush3.bf16.xpose.msra.mxu0 %v121_v6 }
  0x14   :  { %234 = vmatprep.subr.bf16.mxu0 %v286_v1 }
  0x1b   :  { %235 = vmatpush3.bf16.xpose.msra.mxu0 %v124_v8 }
  0x1c   :  { %236 = vmatprep.subr.bf16.mxu0 %v286_v1 }
  0x23   :  { %237 = vmatpush3.bf16.xpose.msra.mxu0 %v127_v10 }
  0x24   :  { %238 = vmatprep.subr.bf16.mxu0 %v286_v1 }
  0x2b   :  { %239 = vmatpush3.bf16.xpose.msra.mxu0 %v130_v12 }
  0x2c   :  { %240 = vmatprep.subr.bf16.mxu0 %v286_v1 }
  0x33   :  { %241 = vmatpush3.bf16.xpose.msra.mxu0 %v133_v23 }
  0x34   :  { %242 = vmatprep.subr.bf16.mxu0 %v286_v1 }
  0x3b   :  { %243 = vmatpush3.bf16.xpose.msra.mxu0 %v136_v30 }
  0x42   :  { %245 = vmatmul.mubr.msk.bf16.vlgmr.msra.gmra.mrb[0].mxu0 %vm110_vm0, %v69_v32 }
 0x115   :  { %v172_v34 = vpop.f32.mrb[0].mxu0 }
 0x116   :  { %v191_v35 = vadd.f32 %v218_v33, %v172_v34  ;;  %v246_v36 = vpop.f32.mrb[1].mxu0 }
 0x117   :  { %v175_v37 = vpop.f32.mrb[2].mxu0 }
 0x118   :  { %192 = vst [vmem:[#allocation3] sm:$0xff] %v191_v35  ;;  %v247_v38 = vpop.f32.mrb[3].mxu0 }
 0x119   :  { %197 = vsyncadd [#allocation4], 96  ;;  %s289_s1 = smov [#allocation3]  }
 0x11a   :  { %s198_s10 = sshll.u32 %s289_s1, 4  ;;  %s199_s10 = int_to_ptr.vmem [resolvable:$true] %s198_s10 }
 0x11b   :  { %s262_s11 = scalar_lea.vmem %s199_s10, 32  ;;  %s266_s12 = scalar_lea.vmem %s199_s10, 128 }
 0x11c   :  { %p263_p0 = scmp.ne.s32.totalorder %s199_s10, %s262_s11  ;;  %p267_p1 = scmp.lt.s32.totalorder %s199_s10, %s199_s10 }
 0x11d   :  { %p268_p2 = scmp.lt.s32.totalorder %s266_s12, %s262_s11 }
 0x11f   :  { %p269_p3 = por %p268_p2, %p267_p1 }
 0x121   :  { %p270_p4 = pnand %p269_p3, %p263_p0 }
 0x123   :  { %273 = shalt.err (!%p270_p4)
}
 0x124   :  { %s274_s14 = scalar_lea.hbm %s375_s3, 32 }
 0x125   :  { %p275_p5 = scmp.ne.s32.totalorder %s375_s3, %s274_s14  ;;  %p278_p6 = scmp.lt.u32.totalorder %s274_s14, %s375_s3 }
 0x127   :  { %p280_p7 = pnand %p278_p6, %p275_p5 }
 0x129   :  { %283 = shalt.err (!%p280_p7)
}
 0x12a   :  { %s290_s19 = smov 32   ;;  %s291_s20 = smov 2  }
 0x12b   :  { %204 = dma.vmem_to_hbm [thread:$0]  %s199_s10, 32, %s375_s3, [#allocation4], %s290_s19, %s290_s19, %s291_s20  }
 0x12c   :  { %284 = dma.done.wait [#allocation4], 128  }
 0x12d   :  { %285 = vsyncadd [#allocation4], 4294967168 }
 0x12e   :  { %208 = vsyncpa [#allocation4], 1 }

</bundles_post_ra>
